<compile_context>
chip_gen: v7x
topology: tpu7x:2x2x1
jax: 0.10.0
libtpu: 0.0.40
codegen_flags: <defaults>
</compile_context>

<pallas_src>
import functools
import math

import jax
import jax.numpy as jnp
from jax.experimental import pallas as pl
from jax.experimental.pallas import tpu as pltpu


# ----------------------------- Pallas kernel -------------------------------

def _conv_shift_gemm_kernel(x_ref, w_ref, scale_ref, o_ref, *,
                            ksize, stride, wp, ho, wo, op_dtype):
    """Implicit-GEMM conv for one image: sum of k*k shifted (C_out,C_in) GEMMs.

    x_ref:     (1, C_in, Hp*Wp)   padded input image, spatially flattened
    w_ref:     (k*k, C_out, C_in) raw (un-normalized) weight, (kh, kw)-major
    scale_ref: (C_out, 1)         f32 per-output-channel normalization scale
    o_ref:     (1, C_out, Ho*Wo)  output image in NCHW element order
    """
    c_out = o_ref.shape[1]
    # Slab length in the (stride-subsampled) flat index space: output position
    # (r, c) lives at slab index r*wp + c; columns c in [wo, wp) are garbage
    # (row wrap) and are dropped during the row compaction below.
    l_slab = (ho - 1) * wp + wo

    x_im = x_ref[0]                                   # (C_in, Hp*Wp)
    acc = jnp.zeros((c_out, l_slab), jnp.float32)

    for kh in range(ksize):                           # static unroll, k*k steps
        for kw in range(ksize):
            off = kh * wp + kw                        # static element offset
            if stride == 1:
                xs = x_im[:, off:off + l_slab]        # (C_in, l_slab)
            else:
                # TODO(synk): lane-strided slab for stride>1 is correct but not
                # exercised by the demo (stride=1); verify lowering per chip.
                xs = x_im[:, off:off + (l_slab - 1) * stride + 1:stride]
            ws = w_ref[kh * ksize + kw]               # (C_out, C_in)
            acc = acc + jnp.dot(ws.astype(op_dtype), xs.astype(op_dtype),
                                preferred_element_type=jnp.float32)

    # Apply the per-channel weight-normalization scale once (f32), then compact
    # padded-width rows (pitch wp) into a dense Ho*Wo NCHW output block.
    res = acc * scale_ref[...]                        # (C_out, l_slab) f32
    for r in range(ho):
        o_ref[0, :, r * wo:(r + 1) * wo] = (
            res[:, r * wp:r * wp + wo].astype(o_ref.dtype))


# ------------------------------- wrapper ------------------------------------

@functools.partial(jax.jit,
                   static_argnames=("stride", "padding", "mxu_bf16_operands"))
def conv2d_forward(x, weight, *, stride, padding, mxu_bf16_operands=False):
    """Forward pass of the PyTorch Conv2d module (eval mode)."""
    n, c_in, h, w = x.shape
    c_out, c_in_w, ksize, _ = weight.shape
    assert c_in_w == c_in
    fan_in = c_in * ksize * ksize
    eps = 1e-4
    alpha = 1.0 / math.sqrt(fan_in)   # sqrt(n.numel()/w.numel()) == 1/sqrt(fan_in)

    hp, wp = h + 2 * padding, w + 2 * padding
    ho = (hp - ksize) // stride + 1
    wo = (wp - ksize) // stride + 1

    # Per-output-channel normalization scale (tiny, f32). Hoisted out of the
    # kernel per review: normalize(w)/sqrt(fan_in) == w * alpha/(eps+alpha*||w||).
    w32 = weight.astype(jnp.float32)
    norm = jnp.sqrt(jnp.sum(w32 * w32, axis=(1, 2, 3)))          # [C_out]
    scale = (jnp.float32(alpha)
             / (jnp.float32(eps) + jnp.float32(alpha) * norm)).reshape(c_out, 1)

    # Raw weight, (kh, kw)-major so the kernel picks one (C_out, C_in) matrix
    # per spatial shift with a static leading-dim index (no relayout).
    w_s = w32.transpose(2, 3, 0, 1).reshape(ksize * ksize, c_out, c_in)

    # Pad once (required by the conv) and flatten H,W. This is the only
    # pre-kernel HBM materialization (~(Hp*Wp)/(H*W) x), no k^2 inflation.
    x_p = jnp.pad(x, ((0, 0), (0, 0), (padding, padding), (padding, padding)))
    x_flat = x_p.reshape(n, c_in, hp * wp)

    op_dtype = jnp.bfloat16 if mxu_bf16_operands else jnp.float32
    if mxu_bf16_operands:
        x_flat = x_flat.astype(jnp.bfloat16)   # halve the dominant HBM operand
        w_s = w_s.astype(jnp.bfloat16)

    kernel = functools.partial(
        _conv_shift_gemm_kernel, ksize=ksize, stride=stride, wp=wp,
        ho=ho, wo=wo, op_dtype=op_dtype)

    l_slab = (ho - 1) * wp + wo
    out_itemsize = jnp.dtype(x.dtype).itemsize
    flops = 2 * n * ksize * ksize * c_out * c_in * l_slab
    bytes_accessed = (x_flat.size * x_flat.dtype.itemsize
                      + w_s.size * w_s.dtype.itemsize
                      + scale.size * 4
                      + n * c_out * ho * wo * out_itemsize)

    # VMEM budget: per-step blocks are tiny here; keep headroom but stay well
    # under v7x's 64 MiB physical (v5e/v6e have 128 MiB).
    blk_bytes = (c_in * hp * wp * x_flat.dtype.itemsize
                 + ksize * ksize * c_out * c_in * w_s.dtype.itemsize
                 + c_out * 4
                 + c_out * ho * wo * out_itemsize
                 + c_out * l_slab * 4)
    vmem_limit = int(min(48 * 1024 * 1024, max(16 * 1024 * 1024, 8 * blk_bytes)))

    out_flat = pl.pallas_call(
        kernel,
        out_shape=jax.ShapeDtypeStruct((n, c_out, ho * wo), x.dtype),
        grid_spec=pltpu.PrefetchScalarGridSpec(
            num_scalar_prefetch=0,
            grid=(n,),                                    # >= 2 steps, parallel
            in_specs=[
                pl.BlockSpec((1, c_in, hp * wp), lambda i: (i, 0, 0)),
                pl.BlockSpec((ksize * ksize, c_out, c_in), lambda i: (0, 0, 0)),
                pl.BlockSpec((c_out, 1), lambda i: (0, 0)),
            ],
            out_specs=pl.BlockSpec((1, c_out, ho * wo), lambda i: (i, 0, 0)),
        ),
        compiler_params=pltpu.CompilerParams(
            dimension_semantics=("parallel",),
            vmem_limit_bytes=vmem_limit,
        ),
        cost_estimate=pl.CostEstimate(
            flops=int(flops), transcendentals=0,
            bytes_accessed=int(bytes_accessed)),
    )(x_flat, w_s, scale)

    # Free bitcast: the kernel already emitted NCHW element order.
    return out_flat.reshape(n, c_out, ho, wo)


# --------------------------------- main --------------------------------------

if __name__ == "__main__":
    key = jax.random.PRNGKey(0)
    k_w, k_x = jax.random.split(key)

    # module config: Conv2d(C_in=4, C_out=8, kernel_size=3, stride=1, padding=1)
    C_in, C_out, ksize, stride, padding = 4, 8, 3, 1, 1
    N, H, W = 2, 16, 16

    weight = jax.random.normal(k_w, (C_out, C_in, ksize, ksize), dtype=jnp.float32)
    x = jax.random.normal(k_x, (N, C_in, H, W), dtype=jnp.float32)

    out = conv2d_forward(x, weight, stride=stride, padding=padding)
    out = jax.block_until_ready(out)

    # sanity check against a pure-JAX reference (silent on success)
    fan_in = C_in * ksize * ksize
    n_norm = jnp.sqrt(jnp.sum(weight.astype(jnp.float32) ** 2,
                              axis=(1, 2, 3), keepdims=True))
    alpha = 1.0 / jnp.sqrt(jnp.float32(fan_in))
    w_ref = weight / (1e-4 + alpha * n_norm) * alpha
    ref = jax.lax.conv_general_dilated(
        x, w_ref, window_strides=(stride, stride),
        padding=[(padding, padding), (padding, padding)],
        dimension_numbers=("NCHW", "OIHW", "NCHW"),
    )
    assert out.shape == (N, C_out, H, W)
    assert jnp.allclose(out, ref, atol=1e-4, rtol=1e-4)

    print("KERNEL_OK")
</pallas_src>

<mosaic_0001>
module attributes {stable_mosaic.version = 11 : i64} {
  func.func @_conv_shift_gemm_kernel(%arg0: i32, %arg1: memref<1x4x324xf32, #tpu.memory_space<vmem>>, %arg2: memref<9x8x4xf32, #tpu.memory_space<vmem>>, %arg3: memref<8x1xf32, #tpu.memory_space<vmem>>, %arg4: memref<1x8x256xf32, #tpu.memory_space<vmem>>) attributes {dimension_semantics = [#tpu.dimension_semantics<parallel>], iteration_bounds = array<i64: 2>, scalar_prefetch = 0 : i64, scratch_operands = 0 : i64, tpu.core_type = #tpu.core_type<tc>, window_params = [{transform_indices = @transform_0, window_bounds = array<i64: 1, 4, 324>}, {pipeline_mode = #tpu.pipeline_mode<synchronous>, transform_indices = @transform_1, window_bounds = array<i64: 9, 8, 4>}, {pipeline_mode = #tpu.pipeline_mode<synchronous>, transform_indices = @transform_2, window_bounds = array<i64: 8, 1>}, {transform_indices = @transform_3, window_bounds = array<i64: 1, 8, 256>}]} {
    %c0 = arith.constant 0 : index
    %c0_0 = arith.constant 0 : index
    %c0_1 = arith.constant 0 : index
    %0 = vector.load %arg1[%c0, %c0_0, %c0_1] : memref<1x4x324xf32, #tpu.memory_space<vmem>>, vector<1x4x324xf32>
    %1 = vector.shape_cast %0 : vector<1x4x324xf32> to vector<4x324xf32>
    %cst = arith.constant 0.000000e+00 : f32
    %2 = vector.broadcast %cst : f32 to vector<8x286xf32>
    %3 = vector.extract_strided_slice %1 {offsets = [0, 0], sizes = [4, 286], strides = [1, 1]} : vector<4x324xf32> to vector<4x286xf32>
    %c0_2 = arith.constant 0 : index
    %c0_3 = arith.constant 0 : index
    %c0_4 = arith.constant 0 : index
    %4 = vector.load %arg2[%c0_2, %c0_3, %c0_4] : memref<9x8x4xf32, #tpu.memory_space<vmem>>, vector<1x8x4xf32>
    %5 = vector.shape_cast %4 : vector<1x8x4xf32> to vector<8x4xf32>
    %cst_5 = arith.constant dense<0.000000e+00> : vector<8x286xf32>
    %6 = tpu.matmul %5, %3, %cst_5 {dimension_numbers = #tpu.dot_dimension_numbers<[1], [0], [0], [1], [0, 0, 1, 1], [], []>} : vector<8x4xf32>, vector<4x286xf32>, vector<8x286xf32> -> vector<8x286xf32>
    %7 = arith.addf %2, %6 : vector<8x286xf32>
    %8 = vector.extract_strided_slice %1 {offsets = [0, 1], sizes = [4, 286], strides = [1, 1]} : vector<4x324xf32> to vector<4x286xf32>
    %c1 = arith.constant 1 : index
    %c0_6 = arith.constant 0 : index
    %c0_7 = arith.constant 0 : index
    %9 = vector.load %arg2[%c1, %c0_6, %c0_7] : memref<9x8x4xf32, #tpu.memory_space<vmem>>, vector<1x8x4xf32>
    %10 = vector.shape_cast %9 : vector<1x8x4xf32> to vector<8x4xf32>
    %cst_8 = arith.constant dense<0.000000e+00> : vector<8x286xf32>
    %11 = tpu.matmul %10, %8, %cst_8 {dimension_numbers = #tpu.dot_dimension_numbers<[1], [0], [0], [1], [0, 0, 1, 1], [], []>} : vector<8x4xf32>, vector<4x286xf32>, vector<8x286xf32> -> vector<8x286xf32>
    %12 = arith.addf %7, %11 : vector<8x286xf32>
    %13 = vector.extract_strided_slice %1 {offsets = [0, 2], sizes = [4, 286], strides = [1, 1]} : vector<4x324xf32> to vector<4x286xf32>
    %c2 = arith.constant 2 : index
    %c0_9 = arith.constant 0 : index
    %c0_10 = arith.constant 0 : index
    %14 = vector.load %arg2[%c2, %c0_9, %c0_10] : memref<9x8x4xf32, #tpu.memory_space<vmem>>, vector<1x8x4xf32>
    %15 = vector.shape_cast %14 : vector<1x8x4xf32> to vector<8x4xf32>
    %cst_11 = arith.constant dense<0.000000e+00> : vector<8x286xf32>
    %16 = tpu.matmul %15, %13, %cst_11 {dimension_numbers = #tpu.dot_dimension_numbers<[1], [0], [0], [1], [0, 0, 1, 1], [], []>} : vector<8x4xf32>, vector<4x286xf32>, vector<8x286xf32> -> vector<8x286xf32>
    %17 = arith.addf %12, %16 : vector<8x286xf32>
    %18 = vector.extract_strided_slice %1 {offsets = [0, 18], sizes = [4, 286], strides = [1, 1]} : vector<4x324xf32> to vector<4x286xf32>
    %c3 = arith.constant 3 : index
    %c0_12 = arith.constant 0 : index
    %c0_13 = arith.constant 0 : index
    %19 = vector.load %arg2[%c3, %c0_12, %c0_13] : memref<9x8x4xf32, #tpu.memory_space<vmem>>, vector<1x8x4xf32>
    %20 = vector.shape_cast %19 : vector<1x8x4xf32> to vector<8x4xf32>
    %cst_14 = arith.constant dense<0.000000e+00> : vector<8x286xf32>
    %21 = tpu.matmul %20, %18, %cst_14 {dimension_numbers = #tpu.dot_dimension_numbers<[1], [0], [0], [1], [0, 0, 1, 1], [], []>} : vector<8x4xf32>, vector<4x286xf32>, vector<8x286xf32> -> vector<8x286xf32>
    %22 = arith.addf %17, %21 : vector<8x286xf32>
    %23 = vector.extract_strided_slice %1 {offsets = [0, 19], sizes = [4, 286], strides = [1, 1]} : vector<4x324xf32> to vector<4x286xf32>
    %c4 = arith.constant 4 : index
    %c0_15 = arith.constant 0 : index
    %c0_16 = arith.constant 0 : index
    %24 = vector.load %arg2[%c4, %c0_15, %c0_16] : memref<9x8x4xf32, #tpu.memory_space<vmem>>, vector<1x8x4xf32>
    %25 = vector.shape_cast %24 : vector<1x8x4xf32> to vector<8x4xf32>
    %cst_17 = arith.constant dense<0.000000e+00> : vector<8x286xf32>
    %26 = tpu.matmul %25, %23, %cst_17 {dimension_numbers = #tpu.dot_dimension_numbers<[1], [0], [0], [1], [0, 0, 1, 1], [], []>} : vector<8x4xf32>, vector<4x286xf32>, vector<8x286xf32> -> vector<8x286xf32>
    %27 = arith.addf %22, %26 : vector<8x286xf32>
    %28 = vector.extract_strided_slice %1 {offsets = [0, 20], sizes = [4, 286], strides = [1, 1]} : vector<4x324xf32> to vector<4x286xf32>
    %c5 = arith.constant 5 : index
    %c0_18 = arith.constant 0 : index
    %c0_19 = arith.constant 0 : index
    %29 = vector.load %arg2[%c5, %c0_18, %c0_19] : memref<9x8x4xf32, #tpu.memory_space<vmem>>, vector<1x8x4xf32>
    %30 = vector.shape_cast %29 : vector<1x8x4xf32> to vector<8x4xf32>
    %cst_20 = arith.constant dense<0.000000e+00> : vector<8x286xf32>
    %31 = tpu.matmul %30, %28, %cst_20 {dimension_numbers = #tpu.dot_dimension_numbers<[1], [0], [0], [1], [0, 0, 1, 1], [], []>} : vector<8x4xf32>, vector<4x286xf32>, vector<8x286xf32> -> vector<8x286xf32>
    %32 = arith.addf %27, %31 : vector<8x286xf32>
    %33 = vector.extract_strided_slice %1 {offsets = [0, 36], sizes = [4, 286], strides = [1, 1]} : vector<4x324xf32> to vector<4x286xf32>
    %c6 = arith.constant 6 : index
    %c0_21 = arith.constant 0 : index
    %c0_22 = arith.constant 0 : index
    %34 = vector.load %arg2[%c6, %c0_21, %c0_22] : memref<9x8x4xf32, #tpu.memory_space<vmem>>, vector<1x8x4xf32>
    %35 = vector.shape_cast %34 : vector<1x8x4xf32> to vector<8x4xf32>
    %cst_23 = arith.constant dense<0.000000e+00> : vector<8x286xf32>
    %36 = tpu.matmul %35, %33, %cst_23 {dimension_numbers = #tpu.dot_dimension_numbers<[1], [0], [0], [1], [0, 0, 1, 1], [], []>} : vector<8x4xf32>, vector<4x286xf32>, vector<8x286xf32> -> vector<8x286xf32>
    %37 = arith.addf %32, %36 : vector<8x286xf32>
    %38 = vector.extract_strided_slice %1 {offsets = [0, 37], sizes = [4, 286], strides = [1, 1]} : vector<4x324xf32> to vector<4x286xf32>
    %c7 = arith.constant 7 : index
    %c0_24 = arith.constant 0 : index
    %c0_25 = arith.constant 0 : index
    %39 = vector.load %arg2[%c7, %c0_24, %c0_25] : memref<9x8x4xf32, #tpu.memory_space<vmem>>, vector<1x8x4xf32>
    %40 = vector.shape_cast %39 : vector<1x8x4xf32> to vector<8x4xf32>
    %cst_26 = arith.constant dense<0.000000e+00> : vector<8x286xf32>
    %41 = tpu.matmul %40, %38, %cst_26 {dimension_numbers = #tpu.dot_dimension_numbers<[1], [0], [0], [1], [0, 0, 1, 1], [], []>} : vector<8x4xf32>, vector<4x286xf32>, vector<8x286xf32> -> vector<8x286xf32>
    %42 = arith.addf %37, %41 : vector<8x286xf32>
    %43 = vector.extract_strided_slice %1 {offsets = [0, 38], sizes = [4, 286], strides = [1, 1]} : vector<4x324xf32> to vector<4x286xf32>
    %c8 = arith.constant 8 : index
    %c0_27 = arith.constant 0 : index
    %c0_28 = arith.constant 0 : index
    %44 = vector.load %arg2[%c8, %c0_27, %c0_28] : memref<9x8x4xf32, #tpu.memory_space<vmem>>, vector<1x8x4xf32>
    %45 = vector.shape_cast %44 : vector<1x8x4xf32> to vector<8x4xf32>
    %cst_29 = arith.constant dense<0.000000e+00> : vector<8x286xf32>
    %46 = tpu.matmul %45, %43, %cst_29 {dimension_numbers = #tpu.dot_dimension_numbers<[1], [0], [0], [1], [0, 0, 1, 1], [], []>} : vector<8x4xf32>, vector<4x286xf32>, vector<8x286xf32> -> vector<8x286xf32>
    %47 = arith.addf %42, %46 : vector<8x286xf32>
    %c0_30 = arith.constant 0 : index
    %c0_31 = arith.constant 0 : index
    %48 = vector.load %arg3[%c0_30, %c0_31] : memref<8x1xf32, #tpu.memory_space<vmem>>, vector<8x1xf32>
    %49 = vector.broadcast %48 : vector<8x1xf32> to vector<8x286xf32>
    %50 = arith.mulf %47, %49 : vector<8x286xf32>
    %51 = vector.extract_strided_slice %50 {offsets = [0, 0], sizes = [8, 16], strides = [1, 1]} : vector<8x286xf32> to vector<8x16xf32>
    %c0_32 = arith.constant 0 : index
    %c0_33 = arith.constant 0 : index
    %c0_34 = arith.constant 0 : index
    %52 = vector.load %arg4[%c0_32, %c0_33, %c0_34] : memref<1x8x256xf32, #tpu.memory_space<vmem>>, vector<1x8x16xf32>
    %53 = vector.shape_cast %52 : vector<1x8x16xf32> to vector<8x16xf32>
    %54 = vector.shape_cast %51 : vector<8x16xf32> to vector<1x8x16xf32>
    tpu.vector_store %arg4[%c0_32, %c0_33, %c0_34], %54 {strides = array<i32>} : memref<1x8x256xf32, #tpu.memory_space<vmem>>, vector<1x8x16xf32>,
    %55 = vector.extract_strided_slice %50 {offsets = [0, 18], sizes = [8, 16], strides = [1, 1]} : vector<8x286xf32> to vector<8x16xf32>
    %c0_35 = arith.constant 0 : index
    %c0_36 = arith.constant 0 : index
    %c16 = arith.constant 16 : index
    %56 = vector.load %arg4[%c0_35, %c0_36, %c16] : memref<1x8x256xf32, #tpu.memory_space<vmem>>, vector<1x8x16xf32>
    %57 = vector.shape_cast %56 : vector<1x8x16xf32> to vector<8x16xf32>
    %58 = vector.shape_cast %55 : vector<8x16xf32> to vector<1x8x16xf32>
    tpu.vector_store %arg4[%c0_35, %c0_36, %c16], %58 {strides = array<i32>} : memref<1x8x256xf32, #tpu.memory_space<vmem>>, vector<1x8x16xf32>,
    %59 = vector.extract_strided_slice %50 {offsets = [0, 36], sizes = [8, 16], strides = [1, 1]} : vector<8x286xf32> to vector<8x16xf32>
    %c0_37 = arith.constant 0 : index
    %c0_38 = arith.constant 0 : index
    %c32 = arith.constant 32 : index
    %60 = vector.load %arg4[%c0_37, %c0_38, %c32] : memref<1x8x256xf32, #tpu.memory_space<vmem>>, vector<1x8x16xf32>
    %61 = vector.shape_cast %60 : vector<1x8x16xf32> to vector<8x16xf32>
    %62 = vector.shape_cast %59 : vector<8x16xf32> to vector<1x8x16xf32>
    tpu.vector_store %arg4[%c0_37, %c0_38, %c32], %62 {strides = array<i32>} : memref<1x8x256xf32, #tpu.memory_space<vmem>>, vector<1x8x16xf32>,
    %63 = vector.extract_strided_slice %50 {offsets = [0, 54], sizes = [8, 16], strides = [1, 1]} : vector<8x286xf32> to vector<8x16xf32>
    %c0_39 = arith.constant 0 : index
    %c0_40 = arith.constant 0 : index
    %c48 = arith.constant 48 : index
    %64 = vector.load %arg4[%c0_39, %c0_40, %c48] : memref<1x8x256xf32, #tpu.memory_space<vmem>>, vector<1x8x16xf32>
    %65 = vector.shape_cast %64 : vector<1x8x16xf32> to vector<8x16xf32>
    %66 = vector.shape_cast %63 : vector<8x16xf32> to vector<1x8x16xf32>
    tpu.vector_store %arg4[%c0_39, %c0_40, %c48], %66 {strides = array<i32>} : memref<1x8x256xf32, #tpu.memory_space<vmem>>, vector<1x8x16xf32>,
    %67 = vector.extract_strided_slice %50 {offsets = [0, 72], sizes = [8, 16], strides = [1, 1]} : vector<8x286xf32> to vector<8x16xf32>
    %c0_41 = arith.constant 0 : index
    %c0_42 = arith.constant 0 : index
    %c64 = arith.constant 64 : index
    %68 = vector.load %arg4[%c0_41, %c0_42, %c64] : memref<1x8x256xf32, #tpu.memory_space<vmem>>, vector<1x8x16xf32>
    %69 = vector.shape_cast %68 : vector<1x8x16xf32> to vector<8x16xf32>
    %70 = vector.shape_cast %67 : vector<8x16xf32> to vector<1x8x16xf32>
    tpu.vector_store %arg4[%c0_41, %c0_42, %c64], %70 {strides = array<i32>} : memref<1x8x256xf32, #tpu.memory_space<vmem>>, vector<1x8x16xf32>,
    %71 = vector.extract_strided_slice %50 {offsets = [0, 90], sizes = [8, 16], strides = [1, 1]} : vector<8x286xf32> to vector<8x16xf32>
    %c0_43 = arith.constant 0 : index
    %c0_44 = arith.constant 0 : index
    %c80 = arith.constant 80 : index
    %72 = vector.load %arg4[%c0_43, %c0_44, %c80] : memref<1x8x256xf32, #tpu.memory_space<vmem>>, vector<1x8x16xf32>
    %73 = vector.shape_cast %72 : vector<1x8x16xf32> to vector<8x16xf32>
    %74 = vector.shape_cast %71 : vector<8x16xf32> to vector<1x8x16xf32>
    tpu.vector_store %arg4[%c0_43, %c0_44, %c80], %74 {strides = array<i32>} : memref<1x8x256xf32, #tpu.memory_space<vmem>>, vector<1x8x16xf32>,
    %75 = vector.extract_strided_slice %50 {offsets = [0, 108], sizes = [8, 16], strides = [1, 1]} : vector<8x286xf32> to vector<8x16xf32>
    %c0_45 = arith.constant 0 : index
    %c0_46 = arith.constant 0 : index
    %c96 = arith.constant 96 : index
    %76 = vector.load %arg4[%c0_45, %c0_46, %c96] : memref<1x8x256xf32, #tpu.memory_space<vmem>>, vector<1x8x16xf32>
    %77 = vector.shape_cast %76 : vector<1x8x16xf32> to vector<8x16xf32>
    %78 = vector.shape_cast %75 : vector<8x16xf32> to vector<1x8x16xf32>
    tpu.vector_store %arg4[%c0_45, %c0_46, %c96], %78 {strides = array<i32>} : memref<1x8x256xf32, #tpu.memory_space<vmem>>, vector<1x8x16xf32>,
    %79 = vector.extract_strided_slice %50 {offsets = [0, 126], sizes = [8, 16], strides = [1, 1]} : vector<8x286xf32> to vector<8x16xf32>
    %c0_47 = arith.constant 0 : index
    %c0_48 = arith.constant 0 : index
    %c112 = arith.constant 112 : index
    %80 = vector.load %arg4[%c0_47, %c0_48, %c112] : memref<1x8x256xf32, #tpu.memory_space<vmem>>, vector<1x8x16xf32>
    %81 = vector.shape_cast %80 : vector<1x8x16xf32> to vector<8x16xf32>
    %82 = vector.shape_cast %79 : vector<8x16xf32> to vector<1x8x16xf32>
    tpu.vector_store %arg4[%c0_47, %c0_48, %c112], %82 {strides = array<i32>} : memref<1x8x256xf32, #tpu.memory_space<vmem>>, vector<1x8x16xf32>,
    %83 = vector.extract_strided_slice %50 {offsets = [0, 144], sizes = [8, 16], strides = [1, 1]} : vector<8x286xf32> to vector<8x16xf32>
    %c0_49 = arith.constant 0 : index
    %c0_50 = arith.constant 0 : index
    %c128 = arith.constant 128 : index
    %84 = vector.load %arg4[%c0_49, %c0_50, %c128] : memref<1x8x256xf32, #tpu.memory_space<vmem>>, vector<1x8x16xf32>
    %85 = vector.shape_cast %84 : vector<1x8x16xf32> to vector<8x16xf32>
    %86 = vector.shape_cast %83 : vector<8x16xf32> to vector<1x8x16xf32>
    tpu.vector_store %arg4[%c0_49, %c0_50, %c128], %86 {strides = array<i32>} : memref<1x8x256xf32, #tpu.memory_space<vmem>>, vector<1x8x16xf32>,
    %87 = vector.extract_strided_slice %50 {offsets = [0, 162], sizes = [8, 16], strides = [1, 1]} : vector<8x286xf32> to vector<8x16xf32>
    %c0_51 = arith.constant 0 : index
    %c0_52 = arith.constant 0 : index
    %c144 = arith.constant 144 : index
    %88 = vector.load %arg4[%c0_51, %c0_52, %c144] : memref<1x8x256xf32, #tpu.memory_space<vmem>>, vector<1x8x16xf32>
    %89 = vector.shape_cast %88 : vector<1x8x16xf32> to vector<8x16xf32>
    %90 = vector.shape_cast %87 : vector<8x16xf32> to vector<1x8x16xf32>
    tpu.vector_store %arg4[%c0_51, %c0_52, %c144], %90 {strides = array<i32>} : memref<1x8x256xf32, #tpu.memory_space<vmem>>, vector<1x8x16xf32>,
    %91 = vector.extract_strided_slice %50 {offsets = [0, 180], sizes = [8, 16], strides = [1, 1]} : vector<8x286xf32> to vector<8x16xf32>
    %c0_53 = arith.constant 0 : index
    %c0_54 = arith.constant 0 : index
    %c160 = arith.constant 160 : index
    %92 = vector.load %arg4[%c0_53, %c0_54, %c160] : memref<1x8x256xf32, #tpu.memory_space<vmem>>, vector<1x8x16xf32>
    %93 = vector.shape_cast %92 : vector<1x8x16xf32> to vector<8x16xf32>
    %94 = vector.shape_cast %91 : vector<8x16xf32> to vector<1x8x16xf32>
    tpu.vector_store %arg4[%c0_53, %c0_54, %c160], %94 {strides = array<i32>} : memref<1x8x256xf32, #tpu.memory_space<vmem>>, vector<1x8x16xf32>,
    %95 = vector.extract_strided_slice %50 {offsets = [0, 198], sizes = [8, 16], strides = [1, 1]} : vector<8x286xf32> to vector<8x16xf32>
    %c0_55 = arith.constant 0 : index
    %c0_56 = arith.constant 0 : index
    %c176 = arith.constant 176 : index
    %96 = vector.load %arg4[%c0_55, %c0_56, %c176] : memref<1x8x256xf32, #tpu.memory_space<vmem>>, vector<1x8x16xf32>
    %97 = vector.shape_cast %96 : vector<1x8x16xf32> to vector<8x16xf32>
    %98 = vector.shape_cast %95 : vector<8x16xf32> to vector<1x8x16xf32>
    tpu.vector_store %arg4[%c0_55, %c0_56, %c176], %98 {strides = array<i32>} : memref<1x8x256xf32, #tpu.memory_space<vmem>>, vector<1x8x16xf32>,
    %99 = vector.extract_strided_slice %50 {offsets = [0, 216], sizes = [8, 16], strides = [1, 1]} : vector<8x286xf32> to vector<8x16xf32>
    %c0_57 = arith.constant 0 : index
    %c0_58 = arith.constant 0 : index
    %c192 = arith.constant 192 : index
    %100 = vector.load %arg4[%c0_57, %c0_58, %c192] : memref<1x8x256xf32, #tpu.memory_space<vmem>>, vector<1x8x16xf32>
    %101 = vector.shape_cast %100 : vector<1x8x16xf32> to vector<8x16xf32>
    %102 = vector.shape_cast %99 : vector<8x16xf32> to vector<1x8x16xf32>
    tpu.vector_store %arg4[%c0_57, %c0_58, %c192], %102 {strides = array<i32>} : memref<1x8x256xf32, #tpu.memory_space<vmem>>, vector<1x8x16xf32>,
    %103 = vector.extract_strided_slice %50 {offsets = [0, 234], sizes = [8, 16], strides = [1, 1]} : vector<8x286xf32> to vector<8x16xf32>
    %c0_59 = arith.constant 0 : index
    %c0_60 = arith.constant 0 : index
    %c208 = arith.constant 208 : index
    %104 = vector.load %arg4[%c0_59, %c0_60, %c208] : memref<1x8x256xf32, #tpu.memory_space<vmem>>, vector<1x8x16xf32>
    %105 = vector.shape_cast %104 : vector<1x8x16xf32> to vector<8x16xf32>
    %106 = vector.shape_cast %103 : vector<8x16xf32> to vector<1x8x16xf32>
    tpu.vector_store %arg4[%c0_59, %c0_60, %c208], %106 {strides = array<i32>} : memref<1x8x256xf32, #tpu.memory_space<vmem>>, vector<1x8x16xf32>,
    %107 = vector.extract_strided_slice %50 {offsets = [0, 252], sizes = [8, 16], strides = [1, 1]} : vector<8x286xf32> to vector<8x16xf32>
    %c0_61 = arith.constant 0 : index
    %c0_62 = arith.constant 0 : index
    %c224 = arith.constant 224 : index
    %108 = vector.load %arg4[%c0_61, %c0_62, %c224] : memref<1x8x256xf32, #tpu.memory_space<vmem>>, vector<1x8x16xf32>
    %109 = vector.shape_cast %108 : vector<1x8x16xf32> to vector<8x16xf32>
    %110 = vector.shape_cast %107 : vector<8x16xf32> to vector<1x8x16xf32>
    tpu.vector_store %arg4[%c0_61, %c0_62, %c224], %110 {strides = array<i32>} : memref<1x8x256xf32, #tpu.memory_space<vmem>>, vector<1x8x16xf32>,
    %111 = vector.extract_strided_slice %50 {offsets = [0, 270], sizes = [8, 16], strides = [1, 1]} : vector<8x286xf32> to vector<8x16xf32>
    %c0_63 = arith.constant 0 : index
    %c0_64 = arith.constant 0 : index
    %c240 = arith.constant 240 : index
    %112 = vector.load %arg4[%c0_63, %c0_64, %c240] : memref<1x8x256xf32, #tpu.memory_space<vmem>>, vector<1x8x16xf32>
    %113 = vector.shape_cast %112 : vector<1x8x16xf32> to vector<8x16xf32>
    %114 = vector.shape_cast %111 : vector<8x16xf32> to vector<1x8x16xf32>
    tpu.vector_store %arg4[%c0_63, %c0_64, %c240], %114 {strides = array<i32>} : memref<1x8x256xf32, #tpu.memory_space<vmem>>, vector<1x8x16xf32>,
    return
  }
  func.func @transform_0(%arg0: i32) -> (i32, i32, i32) {
    %c0_i32 = arith.constant 0 : i32
    %c0_i32_0 = arith.constant 0 : i32
    %c0_i32_1 = arith.constant 0 : i32
    return %arg0, %c0_i32, %c0_i32_0 : i32, i32, i32
  }
  func.func @transform_1(%arg0: i32) -> (i32, i32, i32) {
    %c0_i32 = arith.constant 0 : i32
    %c0_i32_0 = arith.constant 0 : i32
    %c0_i32_1 = arith.constant 0 : i32
    %c0_i32_2 = arith.constant 0 : i32
    return %c0_i32, %c0_i32_0, %c0_i32_1 : i32, i32, i32
  }
  func.func @transform_2(%arg0: i32) -> (i32, i32) {
    %c0_i32 = arith.constant 0 : i32
    %c0_i32_0 = arith.constant 0 : i32
    %c0_i32_1 = arith.constant 0 : i32
    return %c0_i32, %c0_i32_0 : i32, i32
  }
  func.func @transform_3(%arg0: i32) -> (i32, i32, i32) {
    %c0_i32 = arith.constant 0 : i32
    %c0_i32_0 = arith.constant 0 : i32
    %c0_i32_1 = arith.constant 0 : i32
    return %arg0, %c0_i32, %c0_i32_0 : i32, i32, i32
  }
}

</mosaic_0001>

<bundles_post_ra>
// kernel: conv2d_forward.1
= control target key start
LH: loop header
LB: loop body
LE: loop exit
PB: predicated region body
PF: predicated region fallthrough
CT: control target
= control target key end

     0   :  { %s2026_s12 = smov 0   ;;  %s2214_s0 = inlined_call_operand.vmem [shape: f32[2,4,324], index: 0, kind: input, shape index: {}]   ;;  %s2215_s1 = inlined_call_operand.vmem [shape: f32[9,8,4], index: 1, kind: input, shape index: {}]   ;;  %s2216_s2 = inlined_call_operand.vmem [shape: f32[8,1], index: 2, kind: input, shape index: {}]   ;;  %s2217_s3 = inlined_call_operand.vmem [shape: f32[2,8,256], index: 3, kind: output, shape index: {}]  }
   0x1 LB: > { %s1782_s13 = sadd.s32 4294967295, %s1981_s12   ;;  %p1786_p0 = scmp.ge.s32.totalorder %s1981_s12, 1  ;;  %s1981_s12 = sphi %s2026_s12, %s13_s12  }
   0x2   : > { %p137_p1 = scmp.lt.s32.totalorder %s1981_s12, 3 }
   0x4   : > { %p138_p2 = pnand %p1786_p0, %p137_p1 }
   0x5   : > { %p161_p3 = scmp.lt.s32.totalorder (!%p138_p2), %s1782_s13, 1  ;;  %v1983_v0 = vmov (!%p138_p2), 0.0   ;;  %vm1984_vm0 = vmmov (!%p138_p2), 0   ;;  %s1985_s18 = smov (!%p138_p2), 127   ;;  %v1638_v4 = vld [vmem:[%s2216_s2] sm:$0xff] (!%p138_p2)  ;;  %v1993_v5 = vmov (!%p138_p2), 0  }
   0x6   : > { %141 = sbr.rel (%p138_p2) target bundleno = 569 (0x239), region = 32  ;;  %1864 = vmatprep.subr.mxu1 (!%p138_p2), %v1983_v0  ;;  %1866 = vmatprep.mubr.msk.f32.mxu1 (!%p138_p2), %vm1984_vm0, %v1983_v0  ;;  %s1986_s19 = smov (!%p138_p2), 126   ;;  %vm192_vm1 = vcmask (!%p138_p2), 1043456   ;;  %vm185_vm2 = vcmask (!%p138_p2), 1039360   ;;  %v1790_v9 = vld [vmem:[%s2215_s1 + $0x8] sm:$0xff] (!%p138_p2)  ;;  %vm188_vm3 = vcmask (!%p138_p2), 31744  }
   0x7   : > { %263 = vmatprep.mubr.f32.mxu0 (!%p138_p2), %v1983_v0  ;;  %s1987_s20 = smov (!%p138_p2), 110   ;;  %s1988_s21 = smov (!%p138_p2), 109   ;;  %1973 = vset.pattern.permute.xlu0 (!%p138_p2), %v1993_v5  ;;  %vm498_vm4 = vcmask (!%p138_p2), 1031168   ;;  %v173_v16 = vld [vmem:[%s2215_s1] sm:$0xff] (!%p138_p2)  ;;  %vm662_vm5 = vcmask (!%p138_p2), 900096   ;;  %v1801_v23 = vld [vmem:[%s2215_s1 + $0x10] sm:$0xff] (!%p138_p2) }
   0x8   : > { %s1989_s22 = smov (!%p138_p2), 108   ;;  %s1990_s23 = smov (!%p138_p2), 92   ;;  %vm826_vm6 = vcmask (!%p138_p2), 891904   ;;  %v1807_v29 = vld [vmem:[%s2215_s1 + $0x18] sm:$0xff] (!%p138_p2)  ;;  %vm990_vm7 = vcmask (!%p138_p2), 883712   ;;  %v1813_v35 = vld [vmem:[%s2215_s1 + $0x20] sm:$0xff] (!%p138_p2) }
   0x9   : > { %s1991_s24 = smov (!%p138_p2), 91   ;;  %s1992_s25 = smov (!%p138_p2), 90   ;;  %vm1154_vm8 = vcmask (!%p138_p2), 752640   ;;  %v1819_v41 = vld [vmem:[%s2215_s1 + $0x28] sm:$0xff] (!%p138_p2)  ;;  %vm1318_vm9 = vcmask (!%p138_p2), 744448   ;;  %v1825_v46 = vld [vmem:[%s2215_s1 + $0x30] sm:$0xff] (!%p138_p2) }
   0xa   : > { %vm1482_vm10 = vcmask (!%p138_p2), 736256   ;;  %v1831_v52 = vld [vmem:[%s2215_s1 + $0x38] sm:$0xff] (!%p138_p2)  ;;  %v1837_v54 = vld [vmem:[%s2215_s1 + $0x40] sm:$0xff] (!%p138_p2)  ;;  %vm1647_vm11 = vcmask (!%p138_p2), 130048   ;;  %s1994_s28 = smov (!%p138_p2), 100   ;;  %s1996_s29 = smov (!%p138_p2), 124  }
   0xb   : > { %s1997_s30 = smov (!%p138_p2), 122   ;;  %s1998_s4 = smov (!%p138_p2), 120   ;;  %vm1653_vm12 = vcmask (!%p138_p2), 261248   ;;  %vm1658_vm13 = vcmask (!%p138_p2), 392448   ;;  %vm1663_vm14 = vcmask (!%p138_p2), 523648   ;;  %vm1668_vm15 = vcmask (!%p138_p2), 654848  }
   0xc   : > { %s1999_s5 = smov (!%p138_p2), 106   ;;  %s2000_s6 = smov (!%p138_p2), 118  }
   0xd   : > { %s2219_s13 = smov (!%p161_p3, %s1782_s13), 1  ;;  %s2002_s7 = smov 116  }
   0xe   : > { %s1941_s14 = smul.u32 12, %s2219_s13  ;;  %s2003_s8 = smov 102  }
   0xf   : > { %s2004_s9 = smov 112  }
  0x10   : > { %s165_s17 = scalar_lea.vmem %s2214_s0, %s1941_s14 }
  0x11   : > { %v171_v1 = vld [vmem:[%s165_s17] sm:$0xff]  ;;  %v172_v3 = vld [vmem:[%s165_s17 + $0x8] sm:$0xf] }
  0x12   : > { %179 = vrot.lane.b32.xlu1 %v171_v1, %s1985_s18  ;;  %v178_v2 = vcombine.high %v171_v1, %v171_v1 }
  0x14   : > { %181 = vrot.lane.b32.xlu0 %v178_v2, %s1985_s18 }
  0x16   : > { %494 = vrot.lane.b32.xlu1 %v178_v2, %s1986_s19 }
  0x18   : > { %183 = vrot.lane.b32.xlu0 %v172_v3, %s1985_s18 }
  0x1a   : > { %492 = vrot.lane.b32.xlu1 %v171_v1, %s1986_s19 }
  0x1c   : > { %496 = vrot.lane.b32.xlu0 %v172_v3, %s1986_s19 }
  0x1e   : > { %660 = vrot.lane.b32.xlu1 %v172_v3, %s1987_s20 }
  0x20   : > { %658 = vrot.lane.b32.xlu0 %v178_v2, %s1987_s20 }
  0x22   : > { %822 = vrot.lane.b32.xlu1 %v178_v2, %s1988_s21 }
  0x24   : > { %656 = vrot.lane.b32.xlu0 %v171_v1, %s1987_s20 }
  0x26   : > { %820 = vrot.lane.b32.xlu1 %v171_v1, %s1988_s21 }
  0x28   : > { %824 = vrot.lane.b32.xlu0 %v172_v3, %s1988_s21 }
  0x2a   : > { %988 = vrot.lane.b32.xlu1 %v172_v3, %s1989_s22 }
  0x2c   : > { %986 = vrot.lane.b32.xlu0 %v178_v2, %s1989_s22 }
  0x2e   : > { %1150 = vrot.lane.b32.xlu1 %v178_v2, %s1990_s23 }
  0x30   : > { %984 = vrot.lane.b32.xlu0 %v171_v1, %s1989_s22 }
  0x32   : > { %1148 = vrot.lane.b32.xlu1 %v171_v1, %s1990_s23 }
  0x34   : > { %1152 = vrot.lane.b32.xlu0 %v172_v3, %s1990_s23 }
  0x36   : > { %1316 = vrot.lane.b32.xlu1 %v172_v3, %s1991_s24 }
  0x38   : > { %1314 = vrot.lane.b32.xlu0 %v178_v2, %s1991_s24 }
  0x3a   : > { %1478 = vrot.lane.b32.xlu1 %v178_v2, %s1992_s25 }
  0x3c   : > { %1312 = vrot.lane.b32.xlu0 %v171_v1, %s1991_s24  ;;  %s1845_s24 = sshll.u32 %s2219_s13, 4  ;;  %s1995_s13 = smov 114  }
  0x3d   : > { %s2176_s27 = scalar_lea.vmem %s2217_s3, %s1845_s24 }
  0x3e   : > { %1476 = vrot.lane.b32.xlu1 %v171_v1, %s1992_s25 }
  0x40   : > { %1480 = vrot.lane.b32.xlu0 %v172_v3, %s1992_s25 }
  0x44   : > { %1641 = vperm.xlu0 %1973, %v1638_v4  }
  0x84   : > { %v180_v6 = vpop.permute.xlu1 %179 }
  0x86   : > { %v182_v7 = vpop.permute.xlu0 %181 }
  0x87   : > { %v186_v12 = vsel %vm185_vm2, %v180_v6, %v182_v7 }
  0x88   : > { %v495_v8 = vpop.permute.xlu1 %494 }
  0x8a   : > { %v184_v10 = vpop.permute.xlu0 %183 }
  0x8b   : > { %1865 = vmatpush3.msk.msra.mxu1 %vm192_vm1, %v184_v10  ;;  %v187_v11 = vsel %vm185_vm2, %v182_v7, %v184_v10  ;;  %vm1719_vm2 = vcmask 818176  }
  0x8c   : > { %1791 = vmatprep.subr.msk.mxu0 %vm192_vm1, %v187_v11  ;;  %1867 = vmatmul.mubr.msk.f32.vlgmr.msra.gmra.mrb[0].mxu1 %vm188_vm3, %v1790_v9  ;;  %v493_v13 = vpop.permute.xlu1 %492 }
  0x8d   : > { %1792 = vmatpush1.msk.msra.mxu0 %vm192_vm1, %v186_v12  ;;  %1869 = vmatprep.subr.mxu1 %v1983_v0  ;;  %v499_v19 = vsel %vm498_vm4, %v493_v13, %v495_v8 }
  0x8e   : > { %1793 = vmatmul.mubr.msk.f32.vlgmr.msra.gmra.mrb[0].mxu0 %vm188_vm3, %v1790_v9  ;;  %1796 = vmatprep.subr.msk.mxu0 %vm192_vm1, %v178_v2  ;;  %v497_v14 = vpop.permute.xlu0 %496 }
  0x8f   : > { %1797 = vmatpush1.msk.msra.mxu0 %vm192_vm1, %v171_v1  ;;  %v500_v15 = vsel %vm498_vm4, %v495_v8, %v497_v14  ;;  %1870 = vmatpush3.msk.msra.mxu1 %vm192_vm1, %v172_v3  ;;  %vm1685_vm4 = vcmask 932864  }
  0x90   : > { %1871 = vmatprep.mubr.msk.f32.mxu1 %vm1984_vm0, %v1983_v0  ;;  %1802 = vmatprep.subr.msk.mxu0 %vm192_vm1, %v500_v15  ;;  %v661_v18 = vpop.permute.xlu1 %660 }
  0x91   : > { %1874 = vmatprep.subr.mxu1 %v1983_v0  ;;  %413 = vmatprep.mubr.f32.mxu0 %v1983_v0 }
  0x92   : > { %v659_v17 = vpop.permute.xlu0 %658 }
  0x93   : > { %v664_v20 = vsel %vm662_vm5, %v659_v17, %v661_v18 }
  0x94   : > { %1872 = vmatmul.mubr.msk.f32.vlgmr.msra.gmra.mrb[0].mxu1 %vm188_vm3, %v173_v16  ;;  %v823_v22 = vpop.permute.xlu1 %822 }
  0x95   : > { %1875 = vmatpush3.msk.msra.mxu1 %vm192_vm1, %v497_v14  ;;  %1876 = vmatprep.mubr.msk.f32.mxu1 %vm1984_vm0, %v1983_v0 }
  0x96   : > { %1798 = vmatmul.mubr.msk.f32.vlgmr.msra.gmra.mrb[0].mxu0 %vm188_vm3, %v173_v16  ;;  %v657_v21 = vpop.permute.xlu0 %656  ;;  %1879 = vmatprep.subr.mxu1 %v1983_v0 }
  0x97   : > { %1803 = vmatpush1.msk.msra.mxu0 %vm192_vm1, %v499_v19  ;;  %574 = vmatprep.mubr.f32.mxu0 %v1983_v0  ;;  %v663_v25 = vsel %vm662_vm5, %v657_v21, %v659_v17 }
  0x98   : > { %1808 = vmatprep.subr.msk.mxu0 %vm192_vm1, %v664_v20  ;;  %v821_v27 = vpop.permute.xlu1 %820 }
  0x99   : > { %v827_v31 = vsel %vm826_vm6, %v821_v27, %v823_v22 }
  0x9a   : > { %v825_v24 = vpop.permute.xlu0 %824 }
  0x9b   : > { %v828_v26 = vsel %vm826_vm6, %v823_v22, %v825_v24 }
  0x9c   : > { %1877 = vmatmul.mubr.msk.f32.vlgmr.msra.gmra.mrb[0].mxu1 %vm188_vm3, %v1801_v23  ;;  %v989_v30 = vpop.permute.xlu1 %988 }
  0x9d   : > { %1880 = vmatpush3.msk.msra.mxu1 %vm192_vm1, %v661_v18  ;;  %1881 = vmatprep.mubr.msk.f32.mxu1 %vm1984_vm0, %v1983_v0 }
  0x9e   : > { %1804 = vmatmul.mubr.msk.f32.vlgmr.msra.gmra.mrb[0].mxu0 %vm188_vm3, %v1801_v23  ;;  %1884 = vmatprep.subr.mxu1 %v1983_v0  ;;  %v987_v28 = vpop.permute.xlu0 %986 }
  0x9f   : > { %1809 = vmatpush1.msk.msra.mxu0 %vm192_vm1, %v663_v25  ;;  %738 = vmatprep.mubr.f32.mxu0 %v1983_v0  ;;  %v992_v32 = vsel %vm990_vm7, %v987_v28, %v989_v30 }
  0xa0   : > { %1814 = vmatprep.subr.msk.mxu0 %vm192_vm1, %v828_v26  ;;  %v1151_v34 = vpop.permute.xlu1 %1150 }
  0xa2   : > { %v985_v33 = vpop.permute.xlu0 %984 }
  0xa3   : > { %v991_v37 = vsel %vm990_vm7, %v985_v33, %v987_v28 }
  0xa4   : > { %1882 = vmatmul.mubr.msk.f32.vlgmr.msra.gmra.mrb[0].mxu1 %vm188_vm3, %v1807_v29  ;;  %v1149_v39 = vpop.permute.xlu1 %1148 }
  0xa5   : > { %1885 = vmatpush3.msk.msra.mxu1 %vm192_vm1, %v825_v24  ;;  %1886 = vmatprep.mubr.msk.f32.mxu1 %vm1984_vm0, %v1983_v0  ;;  %v1155_v43 = vsel %vm1154_vm8, %v1149_v39, %v1151_v34 }
  0xa6   : > { %1810 = vmatmul.mubr.msk.f32.vlgmr.msra.gmra.mrb[0].mxu0 %vm188_vm3, %v1807_v29  ;;  %1889 = vmatprep.subr.mxu1 %v1983_v0  ;;  %v1153_v36 = vpop.permute.xlu0 %1152 }
  0xa7   : > { %1815 = vmatpush1.msk.msra.mxu0 %vm192_vm1, %v827_v31  ;;  %902 = vmatprep.mubr.f32.mxu0 %v1983_v0  ;;  %v1156_v38 = vsel %vm1154_vm8, %v1151_v34, %v1153_v36 }
  0xa8   : > { %1820 = vmatprep.subr.msk.mxu0 %vm192_vm1, %v992_v32  ;;  %v1317_v42 = vpop.permute.xlu1 %1316 }
  0xaa   : > { %v1315_v40 = vpop.permute.xlu0 %1314 }
  0xab   : > { %v1320_v44 = vsel %vm1318_vm9, %v1315_v40, %v1317_v42 }
  0xac   : > { %1887 = vmatmul.mubr.msk.f32.vlgmr.msra.gmra.mrb[0].mxu1 %vm188_vm3, %v1813_v35  ;;  %v1479_v48 = vpop.permute.xlu1 %1478 }
  0xad   : > { %1890 = vmatpush3.msk.msra.mxu1 %vm192_vm1, %v989_v30  ;;  %1891 = vmatprep.mubr.msk.f32.mxu1 %vm1984_vm0, %v1983_v0 }
  0xae   : > { %1816 = vmatmul.mubr.msk.f32.vlgmr.msra.gmra.mrb[0].mxu0 %vm188_vm3, %v1813_v35  ;;  %1894 = vmatprep.subr.mxu1 %v1983_v0  ;;  %v1313_v45 = vpop.permute.xlu0 %1312 }
  0xaf   : > { %1821 = vmatpush1.msk.msra.mxu0 %vm192_vm1, %v991_v37  ;;  %1066 = vmatprep.mubr.f32.mxu0 %v1983_v0  ;;  %v1319_v49 = vsel %vm1318_vm9, %v1313_v45, %v1315_v40 }
  0xb0   : > { %1826 = vmatprep.subr.msk.mxu0 %vm192_vm1, %v1156_v38  ;;  %v1477_v51 = vpop.permute.xlu1 %1476 }
  0xb1   : > { %v1483_v53 = vsel %vm1482_vm10, %v1477_v51, %v1479_v48 }
  0xb2   : > { %v1481_v47 = vpop.permute.xlu0 %1480 }
  0xb3   : > { %v1484_v50 = vsel %vm1482_vm10, %v1479_v48, %v1481_v47 }
  0xb4   : > { %1892 = vmatmul.mubr.msk.f32.vlgmr.msra.gmra.mrb[0].mxu1 %vm188_vm3, %v1819_v41 }
  0xb5   : > { %1895 = vmatpush3.msk.msra.mxu1 %vm192_vm1, %v1153_v36  ;;  %1896 = vmatprep.mubr.msk.f32.mxu1 %vm1984_vm0, %v1983_v0 }
  0xb6   : > { %1822 = vmatmul.mubr.msk.f32.vlgmr.msra.gmra.mrb[0].mxu0 %vm188_vm3, %v1819_v41  ;;  %1899 = vmatprep.subr.mxu1 %v1983_v0 }
  0xb7   : > { %1827 = vmatpush1.msk.msra.mxu0 %vm192_vm1, %v1155_v43  ;;  %1230 = vmatprep.mubr.f32.mxu0 %v1983_v0 }
  0xb8   : > { %1832 = vmatprep.subr.msk.mxu0 %vm192_vm1, %v1320_v44 }
  0xbc   : > { %1897 = vmatmul.mubr.msk.f32.vlgmr.msra.gmra.mrb[0].mxu1 %vm188_vm3, %v1825_v46 }
  0xbd   : > { %1900 = vmatpush3.msk.msra.mxu1 %vm192_vm1, %v1317_v42  ;;  %1901 = vmatprep.mubr.msk.f32.mxu1 %vm1984_vm0, %v1983_v0 }
  0xbe   : > { %1828 = vmatmul.mubr.msk.f32.vlgmr.msra.gmra.mrb[0].mxu0 %vm188_vm3, %v1825_v46  ;;  %1904 = vmatprep.subr.mxu1 %v1983_v0 }
  0xbf   : > { %1833 = vmatpush1.msk.msra.mxu0 %vm192_vm1, %v1319_v49  ;;  %1394 = vmatprep.mubr.f32.mxu0 %v1983_v0 }
  0xc0   : > { %1838 = vmatprep.subr.msk.mxu0 %vm192_vm1, %v1484_v50 }
  0xc3   : > { %v1642_v55 = vpop.permute.xlu0 %1641 }
  0xc4   : > { %1902 = vmatmul.mubr.msk.f32.vlgmr.msra.gmra.mrb[0].mxu1 %vm188_vm3, %v1831_v52 }
  0xc5   : > { %1905 = vmatpush3.msk.msra.mxu1 %vm192_vm1, %v1481_v47  ;;  %1906 = vmatprep.mubr.msk.f32.mxu1 %vm1984_vm0, %v1983_v0  ;;  %vm1673_vm0 = vcmask 786048  }
  0xc6   : > { %1834 = vmatmul.mubr.msk.f32.vlgmr.msra.gmra.mrb[0].mxu0 %vm188_vm3, %v1831_v52 }
  0xc7   : > { %1839 = vmatpush1.msk.msra.mxu0 %vm192_vm1, %v1483_v53  ;;  %1558 = vmatprep.mubr.f32.mxu0 %v1983_v0  ;;  %vm1678_vm1 = vcmask 917248  }
  0xcc   : > { %1907 = vmatmul.mubr.msk.f32.vlgmr.msra.gmra.mrb[0].mxu1 %vm188_vm3, %v1837_v54 }
  0xce   : > { %1840 = vmatmul.mubr.msk.f32.vlgmr.msra.gmra.mrb[0].mxu0 %vm188_vm3, %v1837_v54  ;;  %vm1688_vm3 = vcmask 1048448  }
 0x19f   : > { %v1631_v56 = vpop.f32.mrb[0].mxu1 }
 0x1a0   : > { %v1646_v57 = vmul.f32 %v1642_v55, %v1631_v56  ;;  %v1908_v58 = vpop.f32.mrb[1].mxu1 }
 0x1a1   : > { %v1560_v59 = vpop.f32.mrb[0].mxu0 }
 0x1a2   : > { %v1644_v60 = vmul.f32 %v1642_v55, %v1560_v59  ;;  %v1562_v61 = vpop.f32.mrb[1].mxu0  ;;  %1717 = vrot.lane.b32.xlu0 %v1646_v57, %s1994_s28 }
 0x1a3   : > { %v1645_v62 = vmul.f32 %v1642_v55, %v1562_v61 }
 0x1a4   : > { %1650 = vrot.lane.b32.xlu1 %v1644_v60, %s1986_s19  ;;  %1648 = vst.msk [vmem:[%s2176_s27] sm:$0xff] %vm1647_vm11, %v1644_v60  ;;  %s2001_s19 = smov 104  }
 0x1a6   : > { %1681 = vrot.lane.b32.xlu0 %v1644_v60, %s1995_s13 }
 0x1a8   : > { %1655 = vrot.lane.b32.xlu1 %v1644_v60, %s1996_s29 }
 0x1aa   : > { %1694 = vrot.lane.b32.xlu0 %v1645_v62, %s1987_s20  ;;  %s2005_s20 = smov 98  }
 0x1ac   : > { %1660 = vrot.lane.b32.xlu1 %v1644_v60, %s1997_s30 }
 0x1ae   : > { %1698 = vrot.lane.b32.xlu0 %v1645_v62, %s1989_s22 }
 0x1b0   : > { %1665 = vrot.lane.b32.xlu1 %v1644_v60, %s1998_s4 }
 0x1b2   : > { %1702 = vrot.lane.b32.xlu0 %v1645_v62, %s1999_s5 }
 0x1b4   : > { %1670 = vrot.lane.b32.xlu1 %v1644_v60, %s2000_s6 }
 0x1b6   : > { %1706 = vrot.lane.b32.xlu0 %v1645_v62, %s2001_s19 }
 0x1b8   : > { %1675 = vrot.lane.b32.xlu1 %v1644_v60, %s2002_s7 }
 0x1ba   : > { %1710 = vrot.lane.b32.xlu0 %v1645_v62, %s2003_s8 }
 0x1bc   : > { %1690 = vrot.lane.b32.xlu1 %v1645_v62, %s2004_s9 }
 0x1be   : > { %1723 = vrot.lane.b32.xlu0 %v1646_v57, %s2005_s20 }
 0x1c0   : > { %1715 = vrot.lane.b32.xlu1 %v1645_v62, %s1994_s28 }
 0x1c4   : > { %1683 = vrot.lane.b32.xlu1 %v1645_v62, %s1995_s13 }
 0x214   : > { %v1718_v63 = vpop.permute.xlu0 %1717 }
 0x216   : > { %v1651_v0 = vpop.permute.xlu1 %1650 }
 0x217   : > { %1654 = vst.msk [vmem:[%s2176_s27] sm:$0xff] %vm1653_vm12, %v1651_v0 }
 0x218   : > { %v1682_v1 = vpop.permute.xlu0 %1681 }
 0x21a   : > { %v1656_v2 = vpop.permute.xlu1 %1655 }
 0x21b   : > { %1659 = vst.msk [vmem:[%s2176_s27] sm:$0xff] %vm1658_vm13, %v1656_v2 }
 0x21c   : > { %v1695_v3 = vpop.permute.xlu0 %1694 }
 0x21e   : > { %v1661_v4 = vpop.permute.xlu1 %1660 }
 0x21f   : > { %1664 = vst.msk [vmem:[%s2176_s27] sm:$0xff] %vm1663_vm14, %v1661_v4 }
 0x220   : > { %v1699_v5 = vpop.permute.xlu0 %1698 }
 0x222   : > { %v1666_v6 = vpop.permute.xlu1 %1665 }
 0x223   : > { %1669 = vst.msk [vmem:[%s2176_s27] sm:$0xff] %vm1668_vm15, %v1666_v6 }
 0x224   : > { %v1703_v7 = vpop.permute.xlu0 %1702 }
 0x226   : > { %v1671_v8 = vpop.permute.xlu1 %1670 }
 0x227   : > { %1674 = vst.msk [vmem:[%s2176_s27] sm:$0xff] %vm1673_vm0, %v1671_v8 }
 0x228   : > { %v1707_v9 = vpop.permute.xlu0 %1706 }
 0x22a   : > { %v1676_v10 = vpop.permute.xlu1 %1675 }
 0x22b   : > { %1679 = vst.msk [vmem:[%s2176_s27] sm:$0xff] %vm1678_vm1, %v1676_v10 }
 0x22c   : > { %v1711_v12 = vpop.permute.xlu0 %1710 }
 0x22e   : > { %v1691_v11 = vpop.permute.xlu1 %1690 }
 0x22f   : > { %1693 = vst.msk [vmem:[%s2176_s27 + $0x8] sm:$0xff] %vm1647_vm11, %v1691_v11 }
 0x230   : > { %1697 = vst.msk [vmem:[%s2176_s27 + $0x8] sm:$0xff] %vm1653_vm12, %v1695_v3  ;;  %v1724_v15 = vpop.permute.xlu0 %1723 }
 0x231   : > { %1701 = vst.msk [vmem:[%s2176_s27 + $0x8] sm:$0xff] %vm1658_vm13, %v1699_v5 }
 0x232   : > { %1705 = vst.msk [vmem:[%s2176_s27 + $0x8] sm:$0xff] %vm1663_vm14, %v1703_v7  ;;  %v1716_v13 = vpop.permute.xlu1 %1715 }
 0x233   : > { %1709 = vst.msk [vmem:[%s2176_s27 + $0x8] sm:$0xff] %vm1668_vm15, %v1707_v9  ;;  %v1720_v14 = vsel %vm1719_vm2, %v1716_v13, %v1718_v63 }
 0x234   : > { %1713 = vst.msk [vmem:[%s2176_s27 + $0x8] sm:$0xff] %vm1673_vm0, %v1711_v12 }
 0x235   : > { %1722 = vst.msk [vmem:[%s2176_s27 + $0x8] sm:$0xff] %vm1678_vm1, %v1720_v14 }
 0x236   : > { %1726 = vst.msk [vmem:[%s2176_s27 + $0x8] sm:$0xff] %vm1688_vm3, %v1724_v15  ;;  %v1684_v16 = vpop.permute.xlu1 %1683 }
 0x237   : > { %v1686_v17 = vsel %vm1685_vm4, %v1682_v1, %v1684_v16 }
 0x238   : > { %1689 = vst.msk [vmem:[%s2176_s27] sm:$0xff] %vm1688_vm3, %v1686_v17 }
 0x239 PF: > { %s13_s12 = sadd.s32 1, %s1981_s12  }
 0x23a   : > { %p10_p4 = scmp.ge.s32.totalorder %s13_s12, 4  }
 0x23c   :  { %12 = sbr.rel (!%p10_p4) target bundleno = 1 (0x1), region = 70 }

</bundles_post_ra>
